<compile_context>
chip_gen: v7x
topology: tpu7x:2x2x1
jax: 0.10.0
libtpu: 0.0.40
codegen_flags: <defaults>
</compile_context>

<pallas_src>
import functools

import jax
import jax.numpy as jnp
from jax import lax
from jax.experimental import pallas as pl
from jax.experimental.pallas import tpu as pltpu


def _cdiv(a, b):
    return (a + b - 1) // b


def _round_up(a, b):
    return _cdiv(a, b) * b


def _column(x, col):
    """x: (C, W) -> x[:, col] as (C, 1), via a lane-masked reduce (safe lowering)."""
    lane = lax.broadcasted_iota(jnp.int32, x.shape, 1)
    return jnp.sum(jnp.where(lane == col, x, jnp.zeros_like(x)),
                   axis=-1, keepdims=True)


# ----------------------------------------------------------------------------- #
# Kernel
# ----------------------------------------------------------------------------- #
def _invert_causal_conv_kernel(*refs, L, TL, TLSEG, HW, WEXT, K, Cin, CSEG, BT,
                               padding_mode, has_halo, edge_mode):
    """One grid step: BT batch rows x TL output columns.

    refs (in order):
      x_ref    (BT, Cin, TL)      current time tile of the input
      halo_ref (BT, Cin, HW)      [only if has_halo] next 128 input cols (clamped)
      w_ref    (Cout, K*CSEG)     im2col-flattened weights (zero padded Cin->CSEG)
      b_ref    (Cout, 1)          bias (f32)
      o_ref    (BT, Cout, TL)     output tile
      win_ref  (CSEG, TL+WEXT)    contiguous window scratch (input dtype)
      xw_ref   (K*CSEG, BT*TLSEG) im2col slab = RHS of the single fused matmul
    """
    if has_halo:
        x_ref, halo_ref, w_ref, b_ref, o_ref, win_ref, xw_ref = refs
    else:
        x_ref, w_ref, b_ref, o_ref, win_ref, xw_ref = refs
        halo_ref = None

    km1 = K - 1
    j = pl.program_id(1)
    t0 = j * TL
    lane = lax.broadcasted_iota(jnp.int32, (CSEG, TL), 1)

    if CSEG != Cin:
        # Zero only the channel-padding rows (their zero weights would otherwise
        # multiply uninitialized scratch, and 0*NaN = NaN).  Tap stores below copy
        # full CSEG-row aligned slices, so these zeros flow into the slab.
        win_ref[Cin:CSEG, :] = jnp.zeros((CSEG - Cin, TL + WEXT), win_ref.dtype)

    def build(masked):
        for bi in range(BT):
            win_ref[:Cin, :TL] = x_ref[bi]
            if has_halo:
                win_ref[:Cin, TL:TL + HW] = halo_ref[bi]
            pad_rep = None
            pad_cols = None
            if masked and km1 > 0:
                if padding_mode == "zeros":
                    pad_rep = jnp.zeros((CSEG, 1), win_ref.dtype)
                elif padding_mode == "reflect":
                    # padded column L+d mirrors column L-2-d
                    pad_cols = [_column(win_ref[...], (L - 2 - d) - t0)
                                for d in range(km1)]
                else:  # "replicate" (module default)
                    pad_rep = _column(win_ref[...], (L - 1) - t0)
            for k in range(K):
                piece = win_ref[:, k:k + TL]              # (CSEG, TL), lane shift
                if masked and km1 > 0:
                    if padding_mode == "reflect":
                        for d in range(k):                # only d < k can occur
                            piece = jnp.where(lane + k == (L - t0) + d,
                                              pad_cols[d], piece)
                    elif k > 0:
                        piece = jnp.where(t0 + lane + k >= L, pad_rep, piece)
                xw_ref[k * CSEG:(k + 1) * CSEG,
                       bi * TLSEG:bi * TLSEG + TL] = piece.astype(xw_ref.dtype)

    if edge_mode == "plain":          # K == 1: no padding / masking ever needed
        build(False)
    elif edge_mode == "static":       # single time tile: always the edge tile
        build(True)
    else:                             # tiled: only the edge tile pays for masking
        is_edge = (j + 1) * TL + km1 > L

        @pl.when(is_edge)
        def _():
            build(True)

        @pl.when(jnp.logical_not(is_edge))
        def _():
            build(False)

    # Single fused MXU matmul over all K taps and all BT batch rows.
    acc = jnp.dot(w_ref[...], xw_ref[...],
                  preferred_element_type=jnp.float32)        # (Cout, BT*TLSEG)
    bias = b_ref[...].astype(jnp.float32)
    for bi in range(BT):
        o_ref[bi] = (acc[:, bi * TLSEG:bi * TLSEG + TL] + bias).astype(o_ref.dtype)


# ----------------------------------------------------------------------------- #
# Parameter repack (hoistable out of the hot path by callers)
# ----------------------------------------------------------------------------- #
def pack_conv1d_params(weight, bias, compute_dtype=None):
    """(Cout, Cin, K) Conv1d weight -> (Cout, K*CSEG) im2col layout, f32 bias col."""
    Cout, Cin, K = weight.shape
    if compute_dtype is None:
        compute_dtype = weight.dtype
    comp_dt = jnp.dtype(compute_dtype)
    cseg = _round_up(Cin, max(8, 32 // comp_dt.itemsize))
    w_aug = jnp.zeros((Cout, K, cseg), comp_dt)
    w_aug = w_aug.at[:, :, :Cin].set(jnp.transpose(weight, (0, 2, 1)).astype(comp_dt))
    return w_aug.reshape(Cout, K * cseg), bias.astype(jnp.float32).reshape(Cout, 1)


# ----------------------------------------------------------------------------- #
# Wrapper
# ----------------------------------------------------------------------------- #
def invert_causal_cnn1d(inp, weight, bias, *, padding_mode="replicate", stride=1,
                        time_tile=2048, compute_dtype=None, packed_params=None):
    """Forward pass of InvertCausalCNN1d.

    inp:    (B, Cin, L)      PyTorch NCL layout
    weight: (Cout, Cin, K)   PyTorch Conv1d weight layout
    bias:   (Cout,)
    returns (B, Cout, L)
    """
    assert stride == 1, "stride != 1 not implemented (module default is 1)"
    # TODO(synk): strided variant (the module constructor allows stride > 1).
    B, Cin, L = inp.shape
    Cout, Cin_w, K = weight.shape
    assert Cin == Cin_w and K >= 1
    if padding_mode not in ("zeros", "reflect"):
        padding_mode = "replicate"           # matches the module's else-branch
    km1 = K - 1
    if padding_mode == "reflect":
        assert km1 < L, "reflect padding needs kernel_size - 1 < length"
    if compute_dtype is None:
        compute_dtype = inp.dtype
    comp_dt = jnp.dtype(compute_dtype)
    in_dt = jnp.dtype(inp.dtype)

    # dtype-aware sublane tile: 8 (f32) / 16 (bf16) / 32 (int8 / fp8)
    cseg = _round_up(Cin, max(8, 32 // comp_dt.itemsize))
    kc = K * cseg

    if packed_params is None:
        w_aug, b_col = pack_conv1d_params(weight, bias, compute_dtype)
    else:
        w_aug, b_col = packed_params
    assert w_aug.shape == (Cout, kc) and b_col.shape == (Cout, 1)

    HW = 128                     # halo block width (lane aligned, >= K-1)
    BUDGET = 28 << 20            # stay well under v7x's 64 MiB physical VMEM

    def est(bt_, tl_, wext_, halo_):
        blocks = (bt_ * Cin * tl_ * in_dt.itemsize            # x tile
                  + bt_ * Cout * tl_ * in_dt.itemsize         # out tile
                  + (bt_ * Cin * HW * in_dt.itemsize if halo_ else 0)
                  + Cout * kc * comp_dt.itemsize + Cout * 4)
        scratch = (cseg * (tl_ + wext_) * in_dt.itemsize
                   + kc * bt_ * _round_up(tl_, 128) * comp_dt.itemsize)
        return 2 * blocks + scratch          # in/out blocks are double-buffered

    # ---- choose the time tiling ---------------------------------------------- #
    tiled, tl = False, L
    if time_tile is not None and km1 <= HW:
        tt = max(128, (int(time_tile) // 128) * 128)
        if L > tt:
            tiled, tl = True, tt
        elif L >= 256 and est(1, L, km1, False) > BUDGET:
            tiled, tl = True, min((L // 128) * 128, tt)       # VMEM guard
    if tiled:
        while tl > 128 and est(1, tl, HW, km1 > 0) > BUDGET:
            tl //= 2
        n_t = _cdiv(L, tl)
        if padding_mode == "reflect" and (L - (n_t - 1) * tl) < km1 + 1:
            # TODO(synk): tiled reflect needs the mirrored columns inside the last
            # tile; widen the halo instead of falling back for this rare shape.
            tiled = False
    if not tiled:
        tl, n_t = L, 1

    has_halo = tiled and km1 > 0
    wext = HW if has_halo else (km1 if n_t == 1 else 0)

    # ---- choose the batch packing --------------------------------------------- #
    if n_t > 1:
        # pack batch rows until a step moves ~1 MiB of activations (cap the unroll)
        bt = max(1, min(B, 8, (1 << 20) // max(1, Cin * tl * in_dt.itemsize)))
    else:
        bt = min(B, 8)
        if B > 1:                  # keep >= 2 parallel steps for v7x's 2 TensorCores
            bt = min(bt, _cdiv(B, 2))
    while bt > 1 and est(bt, tl, wext, has_halo) > BUDGET:
        bt -= 1
    n_b = _cdiv(B, bt)
    tlseg = _round_up(tl, 128)     # lane-aligned per-batch segment inside the slab

    vmem_limit = int(min(max(40 << 20, est(bt, tl, wext, has_halo) + (8 << 20)),
                         112 << 20))
    # TODO(synk): channel-dimension tiling for Cin/Cout so large that even TL=128
    # exceeds the v7x VMEM budget; the current guard only shrinks TL and BT.

    edge_mode = "plain" if km1 == 0 else ("static" if n_t == 1 else "dynamic")

    kernel = functools.partial(
        _invert_causal_conv_kernel,
        L=L, TL=tl, TLSEG=tlseg, HW=HW, WEXT=wext, K=K, Cin=Cin, CSEG=cseg,
        BT=bt, padding_mode=padding_mode, has_halo=has_halo, edge_mode=edge_mode)

    in_specs = [pl.BlockSpec((bt, Cin, tl), lambda b, j: (b, 0, j))]
    inputs = [inp]
    if has_halo:
        hstride = tl // HW
        n_hblk = _cdiv(L, HW)
        in_specs.append(pl.BlockSpec(
            (bt, Cin, HW),
            lambda b, j: (b, 0, jnp.minimum((j + 1) * hstride, n_hblk - 1))))
        inputs.append(inp)         # the halo is a second view of the SAME array
    in_specs += [pl.BlockSpec((Cout, kc), lambda b, j: (0, 0)),
                 pl.BlockSpec((Cout, 1), lambda b, j: (0, 0))]
    inputs += [w_aug, b_col]

    return pl.pallas_call(
        kernel,
        out_shape=jax.ShapeDtypeStruct((B, Cout, L), inp.dtype),
        grid_spec=pltpu.PrefetchScalarGridSpec(
            num_scalar_prefetch=0,
            grid=(n_b, n_t),
            in_specs=in_specs,
            out_specs=pl.BlockSpec((bt, Cout, tl), lambda b, j: (b, 0, j)),
            scratch_shapes=[
                pltpu.VMEM((cseg, tl + wext), inp.dtype),
                pltpu.VMEM((kc, bt * tlseg), comp_dt),
            ],
        ),
        compiler_params=pltpu.CompilerParams(
            dimension_semantics=("parallel", "parallel"),
            vmem_limit_bytes=vmem_limit),
    )(*inputs)


# ----------------------------------------------------------------------------- #
# Pure-JAX reference (matches the PyTorch forward)
# ----------------------------------------------------------------------------- #
def _reference(inp, weight, bias, padding_mode="replicate"):
    B, Cin, L = inp.shape
    Cout, _, K = weight.shape
    pad = K - 1
    if pad > 0:
        if padding_mode == "zeros":
            right = jnp.zeros((B, Cin, pad), inp.dtype)
        elif padding_mode == "reflect":
            idx = jnp.arange(L - 2, L - 2 - pad, -1)
            right = inp[:, :, idx]
        else:
            right = jnp.repeat(inp[:, :, -1:], pad, axis=2)
        x_pad = jnp.concatenate([inp, right], axis=2)
    else:
        x_pad = inp
    windows = jnp.stack([x_pad[:, :, k:k + L] for k in range(K)], axis=-1)
    return jnp.einsum("bclk,ock->bol", windows, weight) + bias[None, :, None]


if __name__ == "__main__":
    key = jax.random.PRNGKey(0)
    ks = jax.random.split(key, 6)

    def make_params(kw, kb, cin, cout, kk):
        bound = 1.0 / ((cin * kk) ** 0.5)
        w = jax.random.uniform(kw, (cout, cin, kk), jnp.float32, -bound, bound)
        b = jax.random.uniform(kb, (cout,), jnp.float32, -bound, bound)
        return w, b

    # ---- small, module-typical shapes: single-tile path, all padding modes -----
    B, Cin, Cout, L, K = 2, 4, 8, 16, 3
    x = jax.random.normal(ks[0], (B, Cin, L), jnp.float32)
    w, b = make_params(ks[1], ks[2], Cin, Cout, K)
    for mode in ("replicate", "zeros", "reflect"):
        out = jax.block_until_ready(invert_causal_cnn1d(x, w, b, padding_mode=mode))
        ref = _reference(x, w, b, mode)
        assert out.shape == (B, Cout, L)
        assert jnp.allclose(out, ref, atol=1e-4, rtol=1e-4), f"small {mode} mismatch"

    # ---- time-tiled path: ragged last tile (L % 128 != 0), batch folded --------
    B2, Cin2, Cout2, L2, K2 = 2, 8, 16, 4200, 5
    x2 = jax.random.normal(ks[3], (B2, Cin2, L2), jnp.float32)
    w2, b2 = make_params(ks[4], ks[5], Cin2, Cout2, K2)
    for mode in ("replicate", "reflect"):
        out2 = jax.block_until_ready(
            invert_causal_cnn1d(x2, w2, b2, padding_mode=mode, time_tile=2048))
        ref2 = _reference(x2, w2, b2, mode)
        assert out2.shape == (B2, Cout2, L2)
        assert jnp.allclose(out2, ref2, atol=1e-4, rtol=1e-4), f"tiled {mode} mismatch"

    print("KERNEL_OK")
</pallas_src>

<mosaic_0001>
module attributes {stable_mosaic.version = 11 : i64} {
  func.func @_invert_causal_conv_kernel(%arg0: i32, %arg1: i32, %arg2: memref<1x4x16xf32, #tpu.memory_space<vmem>>, %arg3: memref<8x24xf32, #tpu.memory_space<vmem>>, %arg4: memref<8x1xf32, #tpu.memory_space<vmem>>, %arg5: memref<1x8x16xf32, #tpu.memory_space<vmem>>, %arg6: memref<8x18xf32, #tpu.memory_space<vmem>>, %arg7: memref<24x128xf32, #tpu.memory_space<vmem>>) attributes {dimension_semantics = [#tpu.dimension_semantics<parallel>, #tpu.dimension_semantics<parallel>], iteration_bounds = array<i64: 2, 1>, scalar_prefetch = 0 : i64, scratch_operands = 2 : i64, tpu.core_type = #tpu.core_type<tc>, window_params = [{transform_indices = @transform_0, window_bounds = array<i64: 1, 4, 16>}, {pipeline_mode = #tpu.pipeline_mode<synchronous>, transform_indices = @transform_1, window_bounds = array<i64: 8, 24>}, {pipeline_mode = #tpu.pipeline_mode<synchronous>, transform_indices = @transform_2, window_bounds = array<i64: 8, 1>}, {transform_indices = @transform_3, window_bounds = array<i64: 1, 8, 16>}]} {
    %c16_i32 = arith.constant 16 : i32
    %0 = arith.muli %arg1, %c16_i32 : i32
    %1 = tpu.iota {dimensions = array<i32: 1>} : vector<8x16xi32>
    %cst = arith.constant 0.000000e+00 : f32
    %2 = vector.broadcast %cst : f32 to vector<4x18xf32>
    %c4 = arith.constant 4 : index
    %c0 = arith.constant 0 : index
    %3 = vector.load %arg6[%c4, %c0] : memref<8x18xf32, #tpu.memory_space<vmem>>, vector<4x18xf32>
    tpu.vector_store %arg6[%c4, %c0], %2 {strides = array<i32>} : memref<8x18xf32, #tpu.memory_space<vmem>>, vector<4x18xf32>,
    %c0_0 = arith.constant 0 : index
    %c0_1 = arith.constant 0 : index
    %c0_2 = arith.constant 0 : index
    %4 = vector.load %arg2[%c0_0, %c0_1, %c0_2] : memref<1x4x16xf32, #tpu.memory_space<vmem>>, vector<1x4x16xf32>
    %5 = vector.shape_cast %4 : vector<1x4x16xf32> to vector<4x16xf32>
    %c0_3 = arith.constant 0 : index
    %c0_4 = arith.constant 0 : index
    %6 = vector.load %arg6[%c0_3, %c0_4] : memref<8x18xf32, #tpu.memory_space<vmem>>, vector<4x16xf32>
    tpu.vector_store %arg6[%c0_3, %c0_4], %5 {strides = array<i32>} : memref<8x18xf32, #tpu.memory_space<vmem>>, vector<4x16xf32>,
    %c0_5 = arith.constant 0 : index
    %c0_6 = arith.constant 0 : index
    %7 = vector.load %arg6[%c0_5, %c0_6] : memref<8x18xf32, #tpu.memory_space<vmem>>, vector<8x18xf32>
    %c15_i32 = arith.constant 15 : i32
    %8 = arith.subi %c15_i32, %0 : i32
    %9 = tpu.iota {dimensions = array<i32: 1>} : vector<8x18xi32>
    %10 = vector.broadcast %8 : i32 to vector<8x18xi32>
    %11 = arith.cmpi eq, %9, %10 : vector<8x18xi32>
    %cst_7 = arith.constant 0.000000e+00 : f32
    %12 = vector.broadcast %cst_7 : f32 to vector<8x18xf32>
    %13 = arith.select %11, %7, %12 : vector<8x18xi1>, vector<8x18xf32>
    %cst_8 = arith.constant dense<0.000000e+00> : vector<8xf32>
    %14 = vector.multi_reduction <add>, %13, %cst_8 [1] : vector<8x18xf32> to vector<8xf32>
    %15 = vector.shape_cast %14 : vector<8xf32> to vector<8x1xf32>
    %c0_9 = arith.constant 0 : index
    %c0_10 = arith.constant 0 : index
    %16 = vector.load %arg6[%c0_9, %c0_10] : memref<8x18xf32, #tpu.memory_space<vmem>>, vector<8x16xf32>
    %c0_11 = arith.constant 0 : index
    %c0_12 = arith.constant 0 : index
    %17 = vector.load %arg7[%c0_11, %c0_12] : memref<24x128xf32, #tpu.memory_space<vmem>>, vector<8x16xf32>
    tpu.vector_store %arg7[%c0_11, %c0_12], %16 {strides = array<i32>} : memref<24x128xf32, #tpu.memory_space<vmem>>, vector<8x16xf32>,
    %c0_13 = arith.constant 0 : index
    %c1 = arith.constant 1 : index
    %18 = vector.load %arg6[%c0_13, %c1] : memref<8x18xf32, #tpu.memory_space<vmem>>, vector<8x16xf32>
    %19 = vector.broadcast %0 : i32 to vector<8x16xi32>
    %20 = arith.addi %19, %1 : vector<8x16xi32>
    %c1_i32 = arith.constant 1 : i32
    %21 = vector.broadcast %c1_i32 : i32 to vector<8x16xi32>
    %22 = arith.addi %20, %21 : vector<8x16xi32>
    %c16_i32_14 = arith.constant 16 : i32
    %23 = vector.broadcast %c16_i32_14 : i32 to vector<8x16xi32>
    %24 = arith.cmpi sge, %22, %23 : vector<8x16xi32>
    %25 = vector.shape_cast %15 : vector<8x1xf32> to vector<8x1xf32>
    %26 = vector.broadcast %25 : vector<8x1xf32> to vector<8x16xf32>
    %27 = arith.select %24, %26, %18 : vector<8x16xi1>, vector<8x16xf32>
    %c8 = arith.constant 8 : index
    %c0_15 = arith.constant 0 : index
    %28 = vector.load %arg7[%c8, %c0_15] : memref<24x128xf32, #tpu.memory_space<vmem>>, vector<8x16xf32>
    tpu.vector_store %arg7[%c8, %c0_15], %27 {strides = array<i32>} : memref<24x128xf32, #tpu.memory_space<vmem>>, vector<8x16xf32>,
    %c0_16 = arith.constant 0 : index
    %c2 = arith.constant 2 : index
    %29 = vector.load %arg6[%c0_16, %c2] : memref<8x18xf32, #tpu.memory_space<vmem>>, vector<8x16xf32>
    %30 = vector.broadcast %0 : i32 to vector<8x16xi32>
    %31 = arith.addi %30, %1 : vector<8x16xi32>
    %c2_i32 = arith.constant 2 : i32
    %32 = vector.broadcast %c2_i32 : i32 to vector<8x16xi32>
    %33 = arith.addi %31, %32 : vector<8x16xi32>
    %c16_i32_17 = arith.constant 16 : i32
    %34 = vector.broadcast %c16_i32_17 : i32 to vector<8x16xi32>
    %35 = arith.cmpi sge, %33, %34 : vector<8x16xi32>
    %36 = vector.shape_cast %15 : vector<8x1xf32> to vector<8x1xf32>
    %37 = vector.broadcast %36 : vector<8x1xf32> to vector<8x16xf32>
    %38 = arith.select %35, %37, %29 : vector<8x16xi1>, vector<8x16xf32>
    %c16 = arith.constant 16 : index
    %c0_18 = arith.constant 0 : index
    %39 = vector.load %arg7[%c16, %c0_18] : memref<24x128xf32, #tpu.memory_space<vmem>>, vector<8x16xf32>
    tpu.vector_store %arg7[%c16, %c0_18], %38 {strides = array<i32>} : memref<24x128xf32, #tpu.memory_space<vmem>>, vector<8x16xf32>,
    %c0_19 = arith.constant 0 : index
    %c0_20 = arith.constant 0 : index
    %40 = vector.load %arg3[%c0_19, %c0_20] : memref<8x24xf32, #tpu.memory_space<vmem>>, vector<8x24xf32>
    %c0_21 = arith.constant 0 : index
    %c0_22 = arith.constant 0 : index
    %41 = vector.load %arg7[%c0_21, %c0_22] : memref<24x128xf32, #tpu.memory_space<vmem>>, vector<24x128xf32>
    %cst_23 = arith.constant dense<0.000000e+00> : vector<8x128xf32>
    %42 = tpu.matmul %40, %41, %cst_23 {dimension_numbers = #tpu.dot_dimension_numbers<[1], [0], [0], [1], [0, 0, 1, 1], [], []>} : vector<8x24xf32>, vector<24x128xf32>, vector<8x128xf32> -> vector<8x128xf32>
    %c0_24 = arith.constant 0 : index
    %c0_25 = arith.constant 0 : index
    %43 = vector.load %arg4[%c0_24, %c0_25] : memref<8x1xf32, #tpu.memory_space<vmem>>, vector<8x1xf32>
    %44 = vector.extract_strided_slice %42 {offsets = [0, 0], sizes = [8, 16], strides = [1, 1]} : vector<8x128xf32> to vector<8x16xf32>
    %45 = vector.broadcast %43 : vector<8x1xf32> to vector<8x16xf32>
    %46 = arith.addf %44, %45 : vector<8x16xf32>
    %c0_26 = arith.constant 0 : index
    %c0_27 = arith.constant 0 : index
    %c0_28 = arith.constant 0 : index
    %47 = vector.load %arg5[%c0_26, %c0_27, %c0_28] : memref<1x8x16xf32, #tpu.memory_space<vmem>>, vector<1x8x16xf32>
    %48 = vector.shape_cast %47 : vector<1x8x16xf32> to vector<8x16xf32>
    %49 = vector.shape_cast %46 : vector<8x16xf32> to vector<1x8x16xf32>
    tpu.vector_store %arg5[%c0_26, %c0_27, %c0_28], %49 {strides = array<i32>} : memref<1x8x16xf32, #tpu.memory_space<vmem>>, vector<1x8x16xf32>,
    return
  }
  func.func @transform_0(%arg0: i32, %arg1: i32) -> (i32, i32, i32) {
    %c0_i32 = arith.constant 0 : i32
    %c0_i32_0 = arith.constant 0 : i32
    return %arg0, %c0_i32, %arg1 : i32, i32, i32
  }
  func.func @transform_1(%arg0: i32, %arg1: i32) -> (i32, i32) {
    %c0_i32 = arith.constant 0 : i32
    %c0_i32_0 = arith.constant 0 : i32
    %c0_i32_1 = arith.constant 0 : i32
    return %c0_i32, %c0_i32_0 : i32, i32
  }
  func.func @transform_2(%arg0: i32, %arg1: i32) -> (i32, i32) {
    %c0_i32 = arith.constant 0 : i32
    %c0_i32_0 = arith.constant 0 : i32
    %c0_i32_1 = arith.constant 0 : i32
    return %c0_i32, %c0_i32_0 : i32, i32
  }
  func.func @transform_3(%arg0: i32, %arg1: i32) -> (i32, i32, i32) {
    %c0_i32 = arith.constant 0 : i32
    %c0_i32_0 = arith.constant 0 : i32
    return %arg0, %c0_i32, %arg1 : i32, i32, i32
  }
}

</mosaic_0001>

<bundles_post_ra>
// kernel: tpu_custom_call.1
= control target key start
LH: loop header
LB: loop body
LE: loop exit
PB: predicated region body
PF: predicated region fallthrough
CT: control target
= control target key end

     0   :  { %8 = vsyncpa [#allocation5], 0  ;;  %s828_s0 = inlined_call_operand.vmem [shape: f32[2,4,16], index: 0, kind: input, shape index: {}]   ;;  %s829_s1 = inlined_call_operand.hbm [shape: f32[8,24], index: 1, kind: input, shape index: {}]   ;;  %s830_s2 = inlined_call_operand.vmem [shape: f32[8,1], index: 2, kind: input, shape index: {}]   ;;  %s831_s3 = inlined_call_operand.hbm [shape: f32[2,8,16], index: 3, kind: output, shape index: {}]  }
   0x1   :  { %9 = vsyncpa [#allocation6], 0 }
   0x2   :  { %11 = vsyncpa [#allocation6 + $0x1], 0  ;;  %s671_s12 = smov 0   ;;  %s673_s13 = smov 0  }
   0x3   :  { %s675_s14 = smov 0   ;;  %s677_s15 = smov 0  }
   0x4   :  { %s679_s16 = smov 0   ;;  %s681_s17 = smov 0  }
   0x5 LB: > { %s427_s18 = sadd.s32 4294967295, %s641_s17   ;;  %s428_s19 = sadd.s32 4294967294, %s641_s17   ;;  %s641_s17 = sphi %s681_s17, %s17_s17   ;;  %s637_s16 = sphi %s679_s16, %s849_s16   ;;  %s633_s15 = sphi %s677_s15, %s848_s15   ;;  %s629_s14 = sphi %s675_s14, %s847_s14   ;;  %s625_s13 = sphi %s673_s13, %s846_s13   ;;  %s621_s12 = sphi %s671_s12, %s845_s12  }
   0x6   : > { %s29_s20 = sadd.s32 1, %s637_s16  ;;  %s108_s21 = sadd.s32 1, %s629_s14 }
   0x7   : > { %p31_p0 = scmp.ge.s32.totalorder %s29_s20, 2  ;;  %p118_p1 = scmp.ne.s32.totalorder %s629_s14, %s625_s13 }
   0x8   : > { %p119_p2 = scmp.eq.s32.totalorder %s427_s18, 1  ;;  %p124_p3 = scmp.ne.s32.totalorder %s625_s13, %s621_s12 }
   0x9   : > { %s851_s20 = smov (%p31_p0, %s29_s20), 0  ;;  %p125_p5 = scmp.eq.s32.totalorder %s428_s19, 1 }
   0xa   : > { %p711_p4 = por %p119_p2, %p118_p1  ;;  %s103_s23 = ssub.s32 %s637_s16, %s851_s20 }
   0xb   : > { %p429_p6 = scmp.ge.s32.totalorder %s641_s17, 1  ;;  %p106_p7 = scmp.eq.s32.totalorder %s103_s23, 0 }
   0xc   : > { %s836_s22 = scalar_select %p711_p4, 1, 0 }
   0xd   : > { %p718_p8 = por %p125_p5, %p124_p3  ;;  %p132_p9 = scmp.lt.s32.totalorder %s641_s17, 3 }
   0xe   : > { %s724_s25 = scalar_select %p106_p7, %s629_s14, %s108_s21  }
   0xf   : > { %s837_s24 = scalar_select %p718_p8, 1, 0 }
  0x10   : > { %p726_p10 = pnand %p429_p6, %p132_p9  ;;  %p730_p11 = scmp.eq.s32.totalorder %s427_s18, 0 }
  0x11   : > { %s643_s28 = smov [#allocation4]   ;;  %s531_s6 = scalar_lea.hbm %s829_s1, 128 }
  0x12   : > { %s838_s26 = scalar_select %p726_p10, 1, 0 }
  0x13   : > { %s839_s27 = scalar_select %p730_p11, 1, 0 }
  0x14   : > { %p463_p12 = pneg %p726_p10  ;;  %s145_s29 = sshll.u32 %s643_s28, 4  ;;  %s146_s29 = int_to_ptr.vmem [resolvable:$true] %s145_s29 }
  0x15   : > { %p532_p0 = scmp.ne.s32.totalorder %s829_s1, %s531_s6  ;;  %p538_p5 = scmp.lt.u32.totalorder %s531_s6, %s829_s1 }
  0x16   : > { %p738_p13 = pnand %p730_p11, %p463_p12 }
  0x18   : > { %p533_p1 = pneg %p738_p13 }
  0x1a   : > { %p534_p2 = pnand %p533_p1, %p532_p0 }
  0x1c   : > { %p535_p3 = pneg %p534_p2 }
  0x1e   : > { %p540_p6 = pnand %p538_p5, %p535_p3 }
  0x20   : > { %543 = shalt.err (!%p540_p6)
}
  0x21   : > { %s544_s11 = scalar_lea.vmem %s146_s29, 128  ;;  %p552_p8 = scmp.lt.s32.totalorder %s146_s29, %s146_s29 }
  0x22   : > { %p545_p7 = scmp.ne.s32.totalorder %s146_s29, %s544_s11  ;;  %p553_p4 = scmp.lt.s32.totalorder %s544_s11, %s544_s11 }
  0x24   : > { %p547_p9 = pnand %p545_p7, %p533_p1  ;;  %p554_p11 = por %p553_p4, %p552_p8 }
  0x26   : > { %p548_p12 = pneg %p547_p9 }
  0x28   : > { %p555_p10 = pnand %p554_p11, %p548_p12 }
  0x2a   : > { %558 = shalt.err (!%p555_p10)
}
  0x2b   : > { %466 = dma.hbm_to_vmem [thread:$0]  (!%p738_p13), %s829_s1, 128, %s146_s29, [#allocation5]  }
  0x2c   : > { %p841_p0 = scmp.ne.s32.totalorder %s838_s26, 0 }
  0x2d   : > { %p842_p2 = scmp.ne.s32.totalorder (!%p841_p0), %s839_s27, 0 }
  0x2e   : > { %171 = sbr.rel (%p841_p0) target bundleno = 461 (0x1cd), region = 32 }
  0x35   : > { %612 = dma.done.wait (%p842_p2), [#allocation5], 128  }
  0x36   : > { %614 = vsyncadd (%p842_p2), [#allocation5], 4294967168  ;;  %p197_p4 = scmp.lt.s32.totalorder %s633_s15, 1  ;;  %vm207_vm0 = vcmask 142336   ;;  %v644_v0 = vmov 0.0   ;;  %v205_v1 = vlaneseq  ;;  %vm210_vm1 = vcmask 125952  }
  0x37   : > { %208 = vst.msk [vmem:[#allocation2 + $0x4] sm:$0xf] %vm207_vm0, %v644_v0  ;;  %vm217_vm3 = vcmask 146432   ;;  %vm221_vm4 = vcmask 130048   ;;  %s645_s26 = smov 126   ;;  %v646_v7 = vmov 0.0|0.0  }
  0x38   : > { %s198_s21 = scalar_select %p197_p4, %s633_s15, 1  ;;  %v206_v3 = vand.u32 127, %v205_v1  ;;  %454 = vmatprep.subr.bf16.mxu0 %v646_v7  ;;  %vm648_vm5 = vmmov 0   ;;  %v321_v8 = vld [vmem:[%s830_s2] sm:$0xff]  ;;  %v649_v9 = vmov 0   ;;  %vm247_vm8 = vcmask 195584  }
  0x39   : > { %s647_s27 = smov 127   ;;  %451 = vmatprep.mubr.msk.f32.mxu0 %vm648_vm5, %v644_v0  ;;  %529 = vset.pattern.permute.xlu1 %v649_v9  ;;  %v243_v20 = vld [vmem:[#allocation4] sm:$0xff]  ;;  %s194_s6 = sand.u32 1, %s625_s13  }
  0x3a   : > { %s435_s23 = sshll.u32 %s198_s21, 2  ;;  %vm215_vm2 = vcmp.eq.s32.totalorder %v206_v3, 15  ;;  %530 = vset.pattern.permute.xlu0 %v649_v9  ;;  %v235_v10 = vadd.s32 2, %v206_v3  ;;  %v226_v12 = vadd.s32 1, %v206_v3  ;;  %s434_s7 = sshll.u32 %s194_s6, 3 }
  0x3b   : > { %s203_s29 = scalar_lea.vmem %s828_s0, %s435_s23  ;;  %s438_s8 = sshll.u32 %s633_s15, 7 }
  0x3c   : > { %v209_v2 = vld [vmem:[%s203_s29] sm:$0xf]  ;;  %vm236_vm6 = vcmp.ge.s32.totalorder %v235_v10, 16  ;;  %vm227_vm7 = vcmp.ge.s32.totalorder %v226_v12, 16  ;;  %s196_s9 = scalar_lea.vmem [#allocation7], %s434_s7  ;;  %s780_s19 = scalar_lea.hbm %s831_s3, %s438_s8 }
  0x3d   : > { %211 = vst.msk [vmem:[#allocation2] sm:$0xf] %vm210_vm1, %v209_v2  ;;  %s344_s10 = sshll.u32 %s196_s9, 4  ;;  %s330_s21 = scalar_lea.sflag [#allocation6], %s194_s6  ;;  %s782_s10 = int_to_ptr.vmem [resolvable:$true] %s344_s10 }
  0x3e   : > { %s559_s23 = scalar_lea.vmem %s782_s10, 128  ;;  %p843_p10 = scmp.ne.s32.totalorder %s836_s22, 0 }
  0x3f   : > { %p560_p8 = scmp.ne.s32.totalorder %s782_s10, %s559_s23  ;;  %s650_s15 = smov [#allocation7]  }
  0x40   : > { %s563_s28 = sshll.u32 %s650_s15, 4  ;;  %s564_s28 = int_to_ptr.vmem [resolvable:$false] %s563_s28 }
  0x41   : > { %p561_p11 = pnand %p560_p8, %p843_p10  ;;  %s565_s30 = scalar_lea.vmem %s564_s28, 256 }
  0x42   : > { %p566_p1 = scmp.lt.s32.totalorder %s782_s10, %s564_s28  ;;  %p567_p3 = scmp.lt.s32.totalorder %s565_s30, %s559_s23 }
  0x43   : > { %p562_p13 = pneg %p561_p11 }
  0x44   : > { %v212_v4 = vld [vmem:[#allocation2] sm:$0xff]  ;;  %p568_p5 = por %p567_p3, %p566_p1 }
  0x45   : > { %v216_v5 = vsel %vm215_vm2, %v212_v4, 0.0  ;;  %222 = vst.msk [vmem:[#allocation3] sm:$0xff] %vm221_vm4, %v212_v4  ;;  %238 = vrot.lane.b32.xlu1 %v212_v4, %s645_s26 }
  0x46   : > { %v218_v6 = vsel %vm217_vm3, %v216_v5, 0.0  ;;  %p569_p6 = pnand %p568_p5, %p562_p13 }
  0x47   : > { %219 = vadd.xlane.f32.xlu0 %v218_v6 }
  0x49   : > { %324 = vperm.xlu1 %529, %v321_v8  }
  0x4c   : > { %v244_v17 = vld [vmem:[#allocation3] sm:$0xff] }
  0x5d   : > { %229 = vrot.lane.b32.xlu0 %v212_v4, %s647_s27 }
  0xb7   : > { %v239_v11 = vpop.permute.xlu1 %238 }
  0xc8   : > { %v325_v22 = vpop.permute.xlu1 %324 }
  0xd4   : > { %v220_v13 = vpop.xlane.xlu0 %219 }
  0xd5   : > { %v241_v14 = vsel %vm236_vm6, %v220_v13, %v239_v11 }
  0xd6   : > { %242 = vst.msk [vmem:[#allocation3 + $0x10] sm:$0xff] %vm221_vm4, %v241_v14 }
  0xd8   : > { %v230_v15 = vpop.permute.xlu0 %229 }
  0xd9   : > { %v232_v16 = vsel %vm227_vm7, %v220_v13, %v230_v15 }
  0xda   : > { %233 = vst.msk [vmem:[#allocation3 + $0x8] sm:$0xff] %vm221_vm4, %v232_v16 }
  0xdd   : > { %v246_v21 = vld [vmem:[#allocation3 + $0x10] sm:$0xff] }
  0xe1   : > { %v245_v18 = vld [vmem:[#allocation3 + $0x8] sm:$0xff] }
  0xe2   : > { %v455_v19 = vpack.c.bf16 %v245_v18, %v244_v17 }
  0xe4   : > { %456 = vmatpush3.bf16.msra.mxu0 %v455_v19 }
  0xe5   : > { %449 = vmatprep.subr.mxu0 %v644_v0 }
  0xe8   : > { %450 = vmatpush3.msra.mxu0 %v246_v21 }
  0xe9   : > { %452 = vmatmul.mubr.msk.f32.vlgmr.msra.gmra.mrb[0].mxu0 %vm247_vm8, %v243_v20 }
 0x1bc   : > { %v317_v23 = vpop.f32.mrb[0].mxu0 }
 0x1bd   : > { %v327_v24 = vadd.f32 %v325_v22, %v317_v23  ;;  %v453_v25 = vpop.f32.mrb[1].mxu0 }
 0x1bf   : > { %328 = vst.msk [vmem:[%s196_s9] sm:$0xff] %vm221_vm4, %v327_v24 }
 0x1c0   : > { %572 = shalt.err (!%p569_p6)
}
 0x1c1   : > { %s573_s29 = scalar_lea.hbm %s780_s19, 128  ;;  %s577_s4 = scalar_lea.hbm %s831_s3, 256 }
 0x1c2   : > { %p574_p7 = scmp.ne.s32.totalorder %s780_s19, %s573_s29  ;;  %p578_p0 = scmp.lt.u32.totalorder %s780_s19, %s831_s3 }
 0x1c3   : > { %p579_p2 = scmp.lt.u32.totalorder %s577_s4, %s573_s29  ;;  %p581_p8 = scmp.lt.u32.totalorder %s573_s29, %s780_s19 }
 0x1c4   : > { %p575_p9 = pnand %p574_p7, %p843_p10 }
 0x1c5   : > { %p580_p4 = por %p579_p2, %p578_p0 }
 0x1c6   : > { %p576_p12 = pneg %p575_p9 }
 0x1c7   : > { %p582_p11 = por %p581_p8, %p580_p4 }
 0x1c9   : > { %p583_p13 = pnand %p582_p11, %p576_p12 }
 0x1cb   : > { %586 = shalt.err (!%p583_p13)
}
 0x1cc   : > { %461 = dma.vmem_to_hbm [thread:$0]  (%p843_p10), %s782_s10, 128, %s780_s19, %s330_s21  }
 0x1cd PF: > { %p473_p1 = scmp.ge.s32.totalorder %s641_s17, 2  ;;  %s356_s7 = sand.u32 1, %s621_s12  }
 0x1ce   : > { %p844_p3 = scmp.ne.s32.totalorder %s837_s24, 0  ;;  %s357_s8 = scalar_lea.sflag [#allocation6], %s356_s7 }
 0x1d0   : > { %p468_p5 = pnand %p473_p1, %p844_p3 }
 0x1d2   : > { %616 = dma.done.wait (!%p468_p5), %s357_s8, 128  }
 0x1d3   : > { %618 = vsyncadd (!%p468_p5), %s357_s8, 4294967168  ;;  %s17_s17 = sadd.s32 1, %s641_s17   ;;  %s845_s12 = smov %s625_s13 }
 0x1d4   : > { %p14_p6 = scmp.ge.s32.totalorder %s17_s17, 4   ;;  %s846_s13 = smov %s629_s14 }
 0x1d5   : > { %s847_s14 = smov %s724_s25  ;;  %s848_s15 = smov %s637_s16 }
 0x1d6   : > { %s849_s16 = smov %s851_s20  ;;  %16 = sbr.rel (!%p14_p6) target bundleno = 5 (0x5), region = 72 }
 0x1dd   :  { %362 = vsyncpa [#allocation5], 1 }
 0x1de   :  { %364 = vsyncpa [#allocation5 + $0x1], 1 }
 0x1df   :  { %365 = vsyncpa [#allocation6], 1 }
 0x1e0   :  { %367 = vsyncpa [#allocation6 + $0x1], 1 }

</bundles_post_ra>
